<compile_context>
chip_gen: v7x
topology: tpu7x:2x2x1
jax: 0.10.0
libtpu: 0.0.40
codegen_flags: <defaults>
</compile_context>

<pallas_src>
import jax
import jax.numpy as jnp
from jax.experimental import pallas as pl
from jax.experimental.pallas import tpu as pltpu

STATE_SIZE = 6       # Acrobot-v1 observation size
STATE_PAD = 8        # contraction dim padded for the fc1 MXU matmul
ACTION_SIZE = 3      # Acrobot-v1 action count
HIDDEN = 125         # real hidden width (LayerNorm is over 125 features)
HIDDEN_PAD = 128     # lane-dense padded hidden width
LN_EPS = 1e-5


def _round_up(n, m):
    return ((n + m - 1) // m) * m


def _layernorm_1pass(h, gamma, beta):
    """LayerNorm over the first HIDDEN lanes of a HIDDEN_PAD-wide tile.

    Pad lanes of `h` are exactly zero by construction, so sum(h) and sum(h*h)
    over all 128 lanes already equal the sums over the 125 real features; no
    mask is needed.  gamma/beta pad lanes are zero, so output pad lanes stay
    exactly zero.
    """
    s1 = jnp.sum(h, axis=-1, keepdims=True)
    s2 = jnp.sum(h * h, axis=-1, keepdims=True)
    mu = s1 * (1.0 / HIDDEN)
    var = jnp.maximum(s2 * (1.0 / HIDDEN) - mu * mu, 0.0)
    return (h - mu) * jax.lax.rsqrt(var + LN_EPS) * gamma + beta


def policy_kernel(x_ref,
                  w1_ref, b1_ref, g1_ref, be1_ref,
                  w2_ref, b2_ref, g2_ref, be2_ref,
                  w3_ref, b3_ref,
                  out_ref):
    x = x_ref[...]                                            # (TB, 8) f32

    # ---- fc1: (TB,8) @ (8,128) on the MXU, kept f32 (MXU has huge slack).
    h = jnp.dot(x, w1_ref[...], preferred_element_type=jnp.float32)
    h = h + b1_ref[...]
    h = _layernorm_1pass(h, g1_ref[...], be1_ref[...])
    h = jnp.maximum(h, 0.0)

    # ---- fc2: (TB,128) @ (128,128), bf16 operands, f32 accumulation.
    h = jnp.dot(h.astype(jnp.bfloat16), w2_ref[...],
                preferred_element_type=jnp.float32) + b2_ref[...]
    h = _layernorm_1pass(h, g2_ref[...], be2_ref[...])
    h = jnp.maximum(h, 0.0)

    # ---- action head + softmax over the 3 actions (dim=1 of the 2-D input).
    logits = jnp.dot(h.astype(jnp.bfloat16), w3_ref[...],
                     preferred_element_type=jnp.float32) + b3_ref[...]
    m = jnp.max(logits, axis=-1, keepdims=True)
    e = jnp.exp(logits - m)
    denom = jnp.sum(e, axis=-1, keepdims=True)
    out_ref[...] = (e * pl.reciprocal(denom, approx=True)).astype(out_ref.dtype)


def policy_forward(x, params, *, block_batch=1024):
    """Runs the policy on a (B, state_size) batch.  Returns (B, action) probs."""
    B, S = x.shape
    SP, HP = params["w1"].shape
    A = params["w3"].shape[1]

    # Batch tile: multiple of 8 sublanes, capped at block_batch, and capped at
    # ~half the batch so the grid has >= 2 steps whenever possible (lets the
    # "parallel" axis shard over v7x's 2 TensorCores).
    B8 = _round_up(B, 8)
    half = _round_up((B8 + 1) // 2, 8)
    TB = max(8, min(_round_up(block_batch, 8), half))
    Bp = _round_up(B, TB)

    pad_rows = Bp - B
    pad_cols = SP - S
    if pad_rows or pad_cols:
        # Rows are independent (sliced off below); pad feature cols hit zero
        # rows of w1 so they contribute nothing.
        x = jnp.pad(x, ((0, pad_rows), (0, pad_cols)))

    const2 = lambda i: (0, 0)
    out = pl.pallas_call(
        policy_kernel,
        out_shape=jax.ShapeDtypeStruct((Bp, A), jnp.float32),
        grid=(Bp // TB,),
        in_specs=[
            pl.BlockSpec((TB, SP), lambda i: (i, 0)),    # x: tiled over batch
            pl.BlockSpec((SP, HP), const2),              # w1   (resident)
            pl.BlockSpec((1, HP), const2),               # b1
            pl.BlockSpec((1, HP), const2),               # gamma1
            pl.BlockSpec((1, HP), const2),               # beta1
            pl.BlockSpec((HP, HP), const2),              # w2
            pl.BlockSpec((1, HP), const2),               # b2
            pl.BlockSpec((1, HP), const2),               # gamma2
            pl.BlockSpec((1, HP), const2),               # beta2
            pl.BlockSpec((HP, A), const2),               # w3
            pl.BlockSpec((1, A), const2),                # b3
        ],
        out_specs=pl.BlockSpec((TB, A), lambda i: (i, 0)),
        compiler_params=pltpu.CompilerParams(
            dimension_semantics=("parallel",),           # megacore on v7x
            vmem_limit_bytes=32 * 1024 * 1024,           # headroom on all gens
        ),
    )(x,
      params["w1"], params["b1"], params["g1"], params["be1"],
      params["w2"], params["b2"], params["g2"], params["be2"],
      params["w3"], params["b3"])
    return out[:B]


def init_params(key, state_size=STATE_SIZE, action_size=ACTION_SIZE,
                hidden=HIDDEN, hidden_pad=HIDDEN_PAD, state_pad=STATE_PAD):
    """PyTorch-Linear-style init (uniform +/- 1/sqrt(fan_in)), padded 125->128.

    All pad rows/columns and the LN gamma/beta/bias pad lanes are zero, so the
    padded hidden lanes carry exactly zero through the whole network.
    """
    ks = jax.random.split(key, 6)

    def lin(kw, kb, fan_in, fan_out):
        bound = 1.0 / jnp.sqrt(float(fan_in))
        w = jax.random.uniform(kw, (fan_in, fan_out), jnp.float32, -bound, bound)
        b = jax.random.uniform(kb, (1, fan_out), jnp.float32, -bound, bound)
        return w, b

    w1, b1 = lin(ks[0], ks[1], state_size, hidden)
    w2, b2 = lin(ks[2], ks[3], hidden, hidden)
    w3, b3 = lin(ks[4], ks[5], hidden, action_size)

    ph = hidden_pad - hidden
    ps = state_pad - state_size
    pad_cols = lambda a: jnp.pad(a, ((0, 0), (0, ph)))

    return dict(
        w1=jnp.pad(w1, ((0, ps), (0, ph))),                       # (8, 128) f32
        b1=pad_cols(b1),                                          # (1, 128) f32
        g1=pad_cols(jnp.ones((1, hidden), jnp.float32)),
        be1=jnp.zeros((1, hidden_pad), jnp.float32),
        w2=jnp.pad(w2, ((0, ph), (0, ph))).astype(jnp.bfloat16),  # (128,128) bf16
        b2=pad_cols(b2),
        g2=pad_cols(jnp.ones((1, hidden), jnp.float32)),
        be2=jnp.zeros((1, hidden_pad), jnp.float32),
        w3=jnp.pad(w3, ((0, ph), (0, 0))).astype(jnp.bfloat16),   # (128, 3) bf16
        b3=b3,                                                    # (1, 3)  f32
    )


def policy_ref_matched(x, p):
    """Pure-JAX reference mirroring the kernel math (padded hidden, f32 fc1,
    bf16 fc2/fc3, one-pass LN stats).  HIGHEST precision so the reference
    itself is not degraded by TPU default matmul precision."""
    hi = jax.lax.Precision.HIGHEST

    def ln(h, g, b):
        mu = jnp.sum(h, -1, keepdims=True) / HIDDEN
        var = jnp.maximum(jnp.sum(h * h, -1, keepdims=True) / HIDDEN - mu * mu, 0.0)
        return (h - mu) * jax.lax.rsqrt(var + LN_EPS) * g + b

    w1 = p["w1"][: x.shape[1], :]
    h = jnp.dot(x, w1, precision=hi) + p["b1"]
    h = jnp.maximum(ln(h, p["g1"], p["be1"]), 0.0)
    h = jnp.dot(h.astype(jnp.bfloat16), p["w2"],
                preferred_element_type=jnp.float32, precision=hi) + p["b2"]
    h = jnp.maximum(ln(h, p["g2"], p["be2"]), 0.0)
    logits = jnp.dot(h.astype(jnp.bfloat16), p["w3"],
                     preferred_element_type=jnp.float32, precision=hi) + p["b3"]
    return jax.nn.softmax(logits, axis=1)


def policy_ref_f32(x, p):
    """PyTorch-faithful f32 reference on the unpadded 125-feature weights."""
    hi = jax.lax.Precision.HIGHEST
    w1 = p["w1"][: x.shape[1], :HIDDEN]; b1 = p["b1"][:, :HIDDEN]
    g1 = p["g1"][:, :HIDDEN]; be1 = p["be1"][:, :HIDDEN]
    w2 = p["w2"].astype(jnp.float32)[:HIDDEN, :HIDDEN]; b2 = p["b2"][:, :HIDDEN]
    g2 = p["g2"][:, :HIDDEN]; be2 = p["be2"][:, :HIDDEN]
    w3 = p["w3"].astype(jnp.float32)[:HIDDEN, :]; b3 = p["b3"]

    def ln(h, g, b):
        mu = jnp.mean(h, -1, keepdims=True)
        var = jnp.mean((h - mu) ** 2, -1, keepdims=True)
        return (h - mu) * jax.lax.rsqrt(var + LN_EPS) * g + b

    h = jnp.maximum(ln(jnp.dot(x, w1, precision=hi) + b1, g1, be1), 0.0)
    h = jnp.maximum(ln(jnp.dot(h, w2, precision=hi) + b2, g2, be2), 0.0)
    return jax.nn.softmax(jnp.dot(h, w3, precision=hi) + b3, axis=1)


# TODO(synk): Categorical action sampling from the returned probabilities is
# left to the caller (it is not part of the module's forward()).

if __name__ == "__main__":
    key = jax.random.PRNGKey(0)
    kx, kp = jax.random.split(key)

    batch = 50                       # deliberately not a multiple of the tile
    x = jax.random.normal(kx, (batch, STATE_SIZE), jnp.float32)
    params = init_params(kp)

    out = jax.block_until_ready(policy_forward(x, params))

    ref_matched = policy_ref_matched(x, params)   # same math as kernel
    ref_f32 = policy_ref_f32(x, params)           # PyTorch-faithful f32

    assert out.shape == (batch, ACTION_SIZE)
    assert bool(jnp.all(jnp.isfinite(out))), "non-finite probabilities"
    # approx reciprocal => rows sum to 1 within ~1e-3 relative error.
    assert jnp.allclose(jnp.sum(out, axis=1), 1.0, atol=5e-3), \
        "softmax rows must sum to ~1"
    assert jnp.allclose(out, ref_matched, atol=1e-2, rtol=1e-2), \
        "mismatch vs matched-precision reference"
    assert jnp.allclose(out, ref_f32, atol=3e-2, rtol=3e-2), \
        "mismatch vs f32 PyTorch-faithful reference"

    print("KERNEL_OK")
</pallas_src>

<mosaic_0001>
module attributes {stable_mosaic.version = 11 : i64} {
  func.func @policy_kernel(%arg0: i32, %arg1: memref<32x8xf32, #tpu.memory_space<vmem>>, %arg2: memref<8x128xf32, #tpu.memory_space<vmem>>, %arg3: memref<1x128xf32, #tpu.memory_space<vmem>>, %arg4: memref<1x128xf32, #tpu.memory_space<vmem>>, %arg5: memref<1x128xf32, #tpu.memory_space<vmem>>, %arg6: memref<128x128xbf16, #tpu.memory_space<vmem>>, %arg7: memref<1x128xf32, #tpu.memory_space<vmem>>, %arg8: memref<1x128xf32, #tpu.memory_space<vmem>>, %arg9: memref<1x128xf32, #tpu.memory_space<vmem>>, %arg10: memref<128x3xbf16, #tpu.memory_space<vmem>>, %arg11: memref<1x3xf32, #tpu.memory_space<vmem>>, %arg12: memref<32x3xf32, #tpu.memory_space<vmem>>) attributes {dimension_semantics = [#tpu.dimension_semantics<parallel>], iteration_bounds = array<i64: 2>, scalar_prefetch = 0 : i64, scratch_operands = 0 : i64, tpu.core_type = #tpu.core_type<tc>, window_params = [{transform_indices = @transform_0, window_bounds = array<i64: 32, 8>}, {pipeline_mode = #tpu.pipeline_mode<synchronous>, transform_indices = @transform_1, window_bounds = array<i64: 8, 128>}, {pipeline_mode = #tpu.pipeline_mode<synchronous>, transform_indices = @transform_2, window_bounds = array<i64: 1, 128>}, {pipeline_mode = #tpu.pipeline_mode<synchronous>, transform_indices = @transform_3, window_bounds = array<i64: 1, 128>}, {pipeline_mode = #tpu.pipeline_mode<synchronous>, transform_indices = @transform_4, window_bounds = array<i64: 1, 128>}, {pipeline_mode = #tpu.pipeline_mode<synchronous>, transform_indices = @transform_5, window_bounds = array<i64: 128, 128>}, {pipeline_mode = #tpu.pipeline_mode<synchronous>, transform_indices = @transform_6, window_bounds = array<i64: 1, 128>}, {pipeline_mode = #tpu.pipeline_mode<synchronous>, transform_indices = @transform_7, window_bounds = array<i64: 1, 128>}, {pipeline_mode = #tpu.pipeline_mode<synchronous>, transform_indices = @transform_8, window_bounds = array<i64: 1, 128>}, {pipeline_mode = #tpu.pipeline_mode<synchronous>, transform_indices = @transform_9, window_bounds = array<i64: 128, 3>}, {pipeline_mode = #tpu.pipeline_mode<synchronous>, transform_indices = @transform_10, window_bounds = array<i64: 1, 3>}, {transform_indices = @transform_11, window_bounds = array<i64: 32, 3>}]} {
    %c0 = arith.constant 0 : index
    %c0_0 = arith.constant 0 : index
    %0 = vector.load %arg1[%c0, %c0_0] : memref<32x8xf32, #tpu.memory_space<vmem>>, vector<32x8xf32>
    %c0_1 = arith.constant 0 : index
    %c0_2 = arith.constant 0 : index
    %1 = vector.load %arg2[%c0_1, %c0_2] : memref<8x128xf32, #tpu.memory_space<vmem>>, vector<8x128xf32>
    %cst = arith.constant dense<0.000000e+00> : vector<32x128xf32>
    %2 = tpu.matmul %0, %1, %cst {dimension_numbers = #tpu.dot_dimension_numbers<[1], [0], [0], [1], [0, 0, 1, 1], [], []>} : vector<32x8xf32>, vector<8x128xf32>, vector<32x128xf32> -> vector<32x128xf32>
    %c0_3 = arith.constant 0 : index
    %c0_4 = arith.constant 0 : index
    %3 = vector.load %arg3[%c0_3, %c0_4] : memref<1x128xf32, #tpu.memory_space<vmem>>, vector<1x128xf32>
    %4 = vector.broadcast %3 : vector<1x128xf32> to vector<32x128xf32>
    %5 = arith.addf %2, %4 : vector<32x128xf32>
    %c0_5 = arith.constant 0 : index
    %c0_6 = arith.constant 0 : index
    %6 = vector.load %arg4[%c0_5, %c0_6] : memref<1x128xf32, #tpu.memory_space<vmem>>, vector<1x128xf32>
    %c0_7 = arith.constant 0 : index
    %c0_8 = arith.constant 0 : index
    %7 = vector.load %arg5[%c0_7, %c0_8] : memref<1x128xf32, #tpu.memory_space<vmem>>, vector<1x128xf32>
    %cst_9 = arith.constant dense<0.000000e+00> : vector<32xf32>
    %8 = vector.multi_reduction <add>, %5, %cst_9 [1] : vector<32x128xf32> to vector<32xf32>
    %9 = vector.shape_cast %8 : vector<32xf32> to vector<32x1xf32>
    %10 = arith.mulf %5, %5 : vector<32x128xf32>
    %cst_10 = arith.constant dense<0.000000e+00> : vector<32xf32>
    %11 = vector.multi_reduction <add>, %10, %cst_10 [1] : vector<32x128xf32> to vector<32xf32>
    %12 = vector.shape_cast %11 : vector<32xf32> to vector<32x1xf32>
    %cst_11 = arith.constant 8.000000e-03 : f32
    %13 = vector.broadcast %cst_11 : f32 to vector<32x1xf32>
    %14 = arith.mulf %9, %13 : vector<32x1xf32>
    %cst_12 = arith.constant 8.000000e-03 : f32
    %15 = vector.broadcast %cst_12 : f32 to vector<32x1xf32>
    %16 = arith.mulf %12, %15 : vector<32x1xf32>
    %17 = arith.mulf %14, %14 : vector<32x1xf32>
    %18 = arith.subf %16, %17 : vector<32x1xf32>
    %cst_13 = arith.constant 0.000000e+00 : f32
    %19 = vector.broadcast %cst_13 : f32 to vector<32x1xf32>
    %20 = arith.maximumf %18, %19 : vector<32x1xf32>
    %21 = vector.broadcast %14 : vector<32x1xf32> to vector<32x128xf32>
    %22 = arith.subf %5, %21 : vector<32x128xf32>
    %cst_14 = arith.constant 9.99999974E-6 : f32
    %23 = vector.broadcast %cst_14 : f32 to vector<32x1xf32>
    %24 = arith.addf %20, %23 : vector<32x1xf32>
    %25 = math.rsqrt %24 : vector<32x1xf32>
    %26 = vector.broadcast %25 : vector<32x1xf32> to vector<32x128xf32>
    %27 = arith.mulf %22, %26 : vector<32x128xf32>
    %28 = vector.broadcast %6 : vector<1x128xf32> to vector<32x128xf32>
    %29 = arith.mulf %27, %28 : vector<32x128xf32>
    %30 = vector.broadcast %7 : vector<1x128xf32> to vector<32x128xf32>
    %31 = arith.addf %29, %30 : vector<32x128xf32>
    %cst_15 = arith.constant 0.000000e+00 : f32
    %32 = vector.broadcast %cst_15 : f32 to vector<32x128xf32>
    %33 = arith.maximumf %31, %32 : vector<32x128xf32>
    %34 = arith.truncf %33 : vector<32x128xf32> to vector<32x128xbf16>
    %c0_16 = arith.constant 0 : index
    %c0_17 = arith.constant 0 : index
    %35 = vector.load %arg6[%c0_16, %c0_17] : memref<128x128xbf16, #tpu.memory_space<vmem>>, vector<128x128xbf16>
    %cst_18 = arith.constant dense<0.000000e+00> : vector<32x128xf32>
    %36 = tpu.matmul %34, %35, %cst_18 {dimension_numbers = #tpu.dot_dimension_numbers<[1], [0], [0], [1], [0, 0, 1, 1], [], []>} : vector<32x128xbf16>, vector<128x128xbf16>, vector<32x128xf32> -> vector<32x128xf32>
    %c0_19 = arith.constant 0 : index
    %c0_20 = arith.constant 0 : index
    %37 = vector.load %arg7[%c0_19, %c0_20] : memref<1x128xf32, #tpu.memory_space<vmem>>, vector<1x128xf32>
    %38 = vector.broadcast %37 : vector<1x128xf32> to vector<32x128xf32>
    %39 = arith.addf %36, %38 : vector<32x128xf32>
    %c0_21 = arith.constant 0 : index
    %c0_22 = arith.constant 0 : index
    %40 = vector.load %arg8[%c0_21, %c0_22] : memref<1x128xf32, #tpu.memory_space<vmem>>, vector<1x128xf32>
    %c0_23 = arith.constant 0 : index
    %c0_24 = arith.constant 0 : index
    %41 = vector.load %arg9[%c0_23, %c0_24] : memref<1x128xf32, #tpu.memory_space<vmem>>, vector<1x128xf32>
    %cst_25 = arith.constant dense<0.000000e+00> : vector<32xf32>
    %42 = vector.multi_reduction <add>, %39, %cst_25 [1] : vector<32x128xf32> to vector<32xf32>
    %43 = vector.shape_cast %42 : vector<32xf32> to vector<32x1xf32>
    %44 = arith.mulf %39, %39 : vector<32x128xf32>
    %cst_26 = arith.constant dense<0.000000e+00> : vector<32xf32>
    %45 = vector.multi_reduction <add>, %44, %cst_26 [1] : vector<32x128xf32> to vector<32xf32>
    %46 = vector.shape_cast %45 : vector<32xf32> to vector<32x1xf32>
    %cst_27 = arith.constant 8.000000e-03 : f32
    %47 = vector.broadcast %cst_27 : f32 to vector<32x1xf32>
    %48 = arith.mulf %43, %47 : vector<32x1xf32>
    %cst_28 = arith.constant 8.000000e-03 : f32
    %49 = vector.broadcast %cst_28 : f32 to vector<32x1xf32>
    %50 = arith.mulf %46, %49 : vector<32x1xf32>
    %51 = arith.mulf %48, %48 : vector<32x1xf32>
    %52 = arith.subf %50, %51 : vector<32x1xf32>
    %cst_29 = arith.constant 0.000000e+00 : f32
    %53 = vector.broadcast %cst_29 : f32 to vector<32x1xf32>
    %54 = arith.maximumf %52, %53 : vector<32x1xf32>
    %55 = vector.broadcast %48 : vector<32x1xf32> to vector<32x128xf32>
    %56 = arith.subf %39, %55 : vector<32x128xf32>
    %cst_30 = arith.constant 9.99999974E-6 : f32
    %57 = vector.broadcast %cst_30 : f32 to vector<32x1xf32>
    %58 = arith.addf %54, %57 : vector<32x1xf32>
    %59 = math.rsqrt %58 : vector<32x1xf32>
    %60 = vector.broadcast %59 : vector<32x1xf32> to vector<32x128xf32>
    %61 = arith.mulf %56, %60 : vector<32x128xf32>
    %62 = vector.broadcast %40 : vector<1x128xf32> to vector<32x128xf32>
    %63 = arith.mulf %61, %62 : vector<32x128xf32>
    %64 = vector.broadcast %41 : vector<1x128xf32> to vector<32x128xf32>
    %65 = arith.addf %63, %64 : vector<32x128xf32>
    %cst_31 = arith.constant 0.000000e+00 : f32
    %66 = vector.broadcast %cst_31 : f32 to vector<32x128xf32>
    %67 = arith.maximumf %65, %66 : vector<32x128xf32>
    %68 = arith.truncf %67 : vector<32x128xf32> to vector<32x128xbf16>
    %c0_32 = arith.constant 0 : index
    %c0_33 = arith.constant 0 : index
    %69 = vector.load %arg10[%c0_32, %c0_33] : memref<128x3xbf16, #tpu.memory_space<vmem>>, vector<128x3xbf16>
    %cst_34 = arith.constant dense<0.000000e+00> : vector<32x3xf32>
    %70 = tpu.matmul %68, %69, %cst_34 {dimension_numbers = #tpu.dot_dimension_numbers<[1], [0], [0], [1], [0, 0, 1, 1], [], []>} : vector<32x128xbf16>, vector<128x3xbf16>, vector<32x3xf32> -> vector<32x3xf32>
    %c0_35 = arith.constant 0 : index
    %c0_36 = arith.constant 0 : index
    %71 = vector.load %arg11[%c0_35, %c0_36] : memref<1x3xf32, #tpu.memory_space<vmem>>, vector<1x3xf32>
    %72 = vector.broadcast %71 : vector<1x3xf32> to vector<32x3xf32>
    %73 = arith.addf %70, %72 : vector<32x3xf32>
    %cst_37 = arith.constant dense<0xFF800000> : vector<32xf32>
    %74 = vector.multi_reduction <maximumf>, %73, %cst_37 [1] : vector<32x3xf32> to vector<32xf32>
    %75 = vector.shape_cast %74 : vector<32xf32> to vector<32x1xf32>
    %76 = vector.broadcast %75 : vector<32x1xf32> to vector<32x3xf32>
    %77 = arith.subf %73, %76 : vector<32x3xf32>
    %78 = math.exp %77 : vector<32x3xf32>
    %cst_38 = arith.constant dense<0.000000e+00> : vector<32xf32>
    %79 = vector.multi_reduction <add>, %78, %cst_38 [1] : vector<32x3xf32> to vector<32xf32>
    %80 = vector.shape_cast %79 : vector<32xf32> to vector<32x1xf32>
    %81 = tpu.reciprocal %80 {approx = true} : vector<32x1xf32> -> vector<32x1xf32>
    %82 = vector.broadcast %81 : vector<32x1xf32> to vector<32x3xf32>
    %83 = arith.mulf %78, %82 : vector<32x3xf32>
    %c0_39 = arith.constant 0 : index
    %c0_40 = arith.constant 0 : index
    %84 = vector.load %arg12[%c0_39, %c0_40] : memref<32x3xf32, #tpu.memory_space<vmem>>, vector<32x3xf32>
    tpu.vector_store %arg12[%c0_39, %c0_40], %83 {strides = array<i32>} : memref<32x3xf32, #tpu.memory_space<vmem>>, vector<32x3xf32>,
    return
  }
  func.func @transform_0(%arg0: i32) -> (i32, i32) {
    %c0_i32 = arith.constant 0 : i32
    %c0_i32_0 = arith.constant 0 : i32
    return %arg0, %c0_i32 : i32, i32
  }
  func.func @transform_1(%arg0: i32) -> (i32, i32) {
    %c0_i32 = arith.constant 0 : i32
    %c0_i32_0 = arith.constant 0 : i32
    %c0_i32_1 = arith.constant 0 : i32
    return %c0_i32, %c0_i32_0 : i32, i32
  }
  func.func @transform_2(%arg0: i32) -> (i32, i32) {
    %c0_i32 = arith.constant 0 : i32
    %c0_i32_0 = arith.constant 0 : i32
    %c0_i32_1 = arith.constant 0 : i32
    return %c0_i32, %c0_i32_0 : i32, i32
  }
  func.func @transform_3(%arg0: i32) -> (i32, i32) {
    %c0_i32 = arith.constant 0 : i32
    %c0_i32_0 = arith.constant 0 : i32
    %c0_i32_1 = arith.constant 0 : i32
    return %c0_i32, %c0_i32_0 : i32, i32
  }
  func.func @transform_4(%arg0: i32) -> (i32, i32) {
    %c0_i32 = arith.constant 0 : i32
    %c0_i32_0 = arith.constant 0 : i32
    %c0_i32_1 = arith.constant 0 : i32
    return %c0_i32, %c0_i32_0 : i32, i32
  }
  func.func @transform_5(%arg0: i32) -> (i32, i32) {
    %c0_i32 = arith.constant 0 : i32
    %c0_i32_0 = arith.constant 0 : i32
    %c0_i32_1 = arith.constant 0 : i32
    return %c0_i32, %c0_i32_0 : i32, i32
  }
  func.func @transform_6(%arg0: i32) -> (i32, i32) {
    %c0_i32 = arith.constant 0 : i32
    %c0_i32_0 = arith.constant 0 : i32
    %c0_i32_1 = arith.constant 0 : i32
    return %c0_i32, %c0_i32_0 : i32, i32
  }
  func.func @transform_7(%arg0: i32) -> (i32, i32) {
    %c0_i32 = arith.constant 0 : i32
    %c0_i32_0 = arith.constant 0 : i32
    %c0_i32_1 = arith.constant 0 : i32
    return %c0_i32, %c0_i32_0 : i32, i32
  }
  func.func @transform_8(%arg0: i32) -> (i32, i32) {
    %c0_i32 = arith.constant 0 : i32
    %c0_i32_0 = arith.constant 0 : i32
    %c0_i32_1 = arith.constant 0 : i32
    return %c0_i32, %c0_i32_0 : i32, i32
  }
  func.func @transform_9(%arg0: i32) -> (i32, i32) {
    %c0_i32 = arith.constant 0 : i32
    %c0_i32_0 = arith.constant 0 : i32
    %c0_i32_1 = arith.constant 0 : i32
    return %c0_i32, %c0_i32_0 : i32, i32
  }
  func.func @transform_10(%arg0: i32) -> (i32, i32) {
    %c0_i32 = arith.constant 0 : i32
    %c0_i32_0 = arith.constant 0 : i32
    %c0_i32_1 = arith.constant 0 : i32
    return %c0_i32, %c0_i32_0 : i32, i32
  }
  func.func @transform_11(%arg0: i32) -> (i32, i32) {
    %c0_i32 = arith.constant 0 : i32
    %c0_i32_0 = arith.constant 0 : i32
    return %arg0, %c0_i32 : i32, i32
  }
}

</mosaic_0001>

<bundles_post_ra>
// kernel: tpu_custom_call.1
= control target key start
LH: loop header
LB: loop body
LE: loop exit
PB: predicated region body
PF: predicated region fallthrough
CT: control target
= control target key end

     0   :  { %s1249_s17 = smov 0   ;;  %s1405_s0 = inlined_call_operand.vmem [shape: f32[64,8], index: 0, kind: input, shape index: {}]   ;;  %s1406_s1 = inlined_call_operand.vmem [shape: f32[8,128], index: 1, kind: input, shape index: {}]   ;;  %s1407_s2 = inlined_call_operand.vmem [shape: f32[1,128], index: 2, kind: input, shape index: {}]   ;;  %s1408_s3 = inlined_call_operand.vmem [shape: f32[1,128], index: 3, kind: input, shape index: {}]   ;;  %s1409_s4 = inlined_call_operand.vmem [shape: f32[1,128], index: 4, kind: input, shape index: {}]   ;;  %s1410_s5 = inlined_call_operand.vmem [shape: bf16[128,128], index: 5, kind: input, shape index: {}]   ;;  %s1411_s6 = inlined_call_operand.vmem [shape: f32[1,128], index: 6, kind: input, shape index: {}]   ;;  %s1412_s7 = inlined_call_operand.vmem [shape: f32[1,128], index: 7, kind: input, shape index: {}]   ;;  %s1413_s8 = inlined_call_operand.vmem [shape: f32[1,128], index: 8, kind: input, shape index: {}]   ;;  %s1414_s9 = inlined_call_operand.vmem [shape: bf16[128,3], index: 9, kind: input, shape index: {}]   ;;  %s1415_s10 = inlined_call_operand.vmem [shape: f32[1,3], index: 10, kind: input, shape index: {}]   ;;  %s1416_s11 = inlined_call_operand.vmem [shape: f32[64,3], index: 11, kind: output, shape index: {}]  }
   0x1 LB: > { %s1014_s18 = sadd.s32 4294967295, %s1187_s17   ;;  %p1018_p0 = scmp.ge.s32.totalorder %s1187_s17, 1  ;;  %s1187_s17 = sphi %s1249_s17, %s21_s17  }
   0x2   : > { %p338_p1 = scmp.lt.s32.totalorder %s1187_s17, 3 }
   0x4   : > { %p339_p2 = pnand %p1018_p0, %p338_p1 }
   0x5   : > { %v395_v0 = vld [vmem:[%s1406_s1] sm:$0xff] (!%p339_p2)  ;;  %s1019_s21 = sshll.u32 (!%p339_p2), %s1014_s18, 2  ;;  %vm403_vm0 = vcmask (!%p339_p2), 64512   ;;  %v1134_v19 = vld [vmem:[%s1410_s5 + $0x8] sm:$0xff] (!%p339_p2)   ;;  %v1135_v20 = vld [vmem:[%s1410_s5 + $0x10] sm:$0xff] (!%p339_p2)   ;;  %vm909_vm1 = vcmask (!%p339_p2), 23552  }
   0x6   : > { %342 = sbr.rel (%p339_p2) target bundleno = 1352 (0x548), region = 64  ;;  %1077 = vmatprep.subr.mxu0 (!%p339_p2), %v395_v0  ;;  %p379_p3 = scmp.lt.s32.totalorder (!%p339_p2), %s1019_s21, 7  ;;  %v1023_v5 = vld [vmem:[%s1407_s2] ss:$0 sm:$0xff] (!%p339_p2)  ;;  %v1136_v21 = vld [vmem:[%s1410_s5 + $0x18] sm:$0xff] (!%p339_p2)   ;;  %v1138_v23 = vld [vmem:[%s1410_s5 + $0x28] sm:$0xff] (!%p339_p2)  }
   0x7   : > { %1078 = vmatpush3.msra.mxu0 (!%p339_p2), %v395_v0  ;;  %v1133_v18 = vld [vmem:[%s1410_s5] sm:$0xff] (!%p339_p2)   ;;  %v1139_v24 = vld [vmem:[%s1410_s5 + $0x30] sm:$0xff] (!%p339_p2)   ;;  %v1140_v25 = vld [vmem:[%s1410_s5 + $0x38] sm:$0xff] (!%p339_p2)  }
   0x8   : > { %1085 = vmatprep.subr.bf16.mxu1 (!%p339_p2), %v1133_v18  ;;  %v1137_v22 = vld [vmem:[%s1410_s5 + $0x20] sm:$0xff] (!%p339_p2)  }
   0x9   : > { %1086 = vmatpush3.bf16.msra.mxu1 (!%p339_p2), %v1133_v18  ;;  %v1028_v61 = vld [vmem:[%s1408_s3] ss:$0 sm:$0xff] (!%p339_p2) }
   0xa   : > { %1087 = vmatprep.subr.bf16.mxu1 (!%p339_p2), %v1134_v19 }
   0xd   : > { %s1418_s21 = smov (!%p379_p3, %s1019_s21), 7  ;;  %1088 = vmatpush3.bf16.msra.mxu1 %v1134_v19 }
   0xe   : > { %s1020_s22 = sshll.u32 %s1418_s21, 3  ;;  %1089 = vmatprep.subr.bf16.mxu1 %v1135_v20 }
   0xf   : > { %s382_s25 = scalar_lea.vmem %s1405_s0, %s1020_s22  ;;  %s388_s26 = scalar_lea.vmem %s1416_s11, %s1020_s22 }
  0x10   : > { %v391_v1 = vld [vmem:[%s382_s25] sm:$0xff]  ;;  %v392_v2 = vld [vmem:[%s382_s25 + $0x8] sm:$0xff]  ;;  %v393_v3 = vld [vmem:[%s382_s25 + $0x10] sm:$0xff] }
  0x11   : > { %1079 = vmatprep.mubr.msk.f32.mxu0 %vm403_vm0, %v391_v1  ;;  %v394_v4 = vld [vmem:[%s382_s25 + $0x18] sm:$0xff]  ;;  %1090 = vmatpush3.bf16.msra.mxu1 %v1135_v20  ;;  %v1029_v1 = vld [vmem:[%s1409_s4] ss:$0 sm:$0xff] }
  0x12   : > { %1080 = vmatmul.mubr.msk.f32.vlgmr.msra.gmra.mrb[0].mxu0 %vm403_vm0, %v392_v2  ;;  %1091 = vmatprep.subr.bf16.mxu1 %v1136_v21 }
  0x13   : > { %1082 = vmatprep.mubr.msk.f32.mxu0 %vm403_vm0, %v393_v3 }
  0x15   : > { %1092 = vmatpush3.bf16.msra.mxu1 %v1136_v21 }
  0x16   : > { %1083 = vmatmul.mubr.msk.f32.gmra.mrb[2].mxu0 %vm403_vm0, %v394_v4  ;;  %1093 = vmatprep.subr.bf16.mxu1 %v1137_v22 }
  0x19   : > { %1094 = vmatpush3.bf16.msra.mxu1 %v1137_v22 }
  0x1a   : > { %1095 = vmatprep.subr.bf16.mxu1 %v1138_v23 }
  0x1d   : > { %1096 = vmatpush3.bf16.msra.mxu1 %v1138_v23 }
  0x1e   : > { %1097 = vmatprep.subr.bf16.mxu1 %v1139_v24 }
  0x21   : > { %1098 = vmatpush3.bf16.msra.mxu1 %v1139_v24 }
  0x22   : > { %1099 = vmatprep.subr.bf16.mxu1 %v1140_v25 }
  0x25   : > { %1100 = vmatpush3.bf16.msra.mxu1 %v1140_v25 }
  0xe5   : > { %v1081_v6 = vpop.f32.mrb[0].mxu0 }
  0xe6   : > { %v1271_v7 = vadd.f32 %v1081_v6, %v1023_v5  ;;  %v482_v8 = vpop.f32.mrb[1].mxu0 }
  0xe7   : > { %v1276_v11 = vadd.f32 %v1023_v5, %v482_v8 }
  0xe8   : > { %505 = vadd.xlane.f32.xlu0 %v1271_v7  ;;  %v512_v9 = vmul.f32 %v1271_v7, %v1271_v7 }
  0xe9   : > { %v1084_v10 = vpop.f32.mrb[2].mxu0  ;;  %v511_v15 = vmul.f32 %v1276_v11, %v1276_v11 }
  0xea   : > { %517 = vadd.xlane.f32.xlu1 %v512_v9  ;;  %v1278_v12 = vadd.f32 %v1084_v10, %v1023_v5  ;;  %v492_v13 = vpop.f32.mrb[3].mxu0 }
  0xeb   : > { %v1281_v14 = vadd.f32 %v1023_v5, %v492_v13 }
  0xec   : > { %503 = vadd.xlane.f32.xlu0 %v1276_v11  ;;  %v514_v17 = vmul.f32 %v1278_v12, %v1278_v12 }
  0xed   : > { %v513_v16 = vmul.f32 %v1281_v14, %v1281_v14 }
  0xee   : > { %509 = vadd.xlane.f32.xlu1 %v1278_v12 }
  0xf0   : > { %515 = vadd.xlane.f32.xlu0 %v511_v15 }
  0xf2   : > { %507 = vadd.xlane.f32.xlu1 %v1281_v14 }
  0xf4   : > { %519 = vadd.xlane.f32.xlu0 %v513_v16 }
  0xf6   : > { %521 = vadd.xlane.f32.xlu1 %v514_v17 }
 0x175   : > { %v506_v26 = vpop.xlane.xlu0 %505 }
 0x176   : > { %v524_v27 = vmul.f32 0.008, %v506_v26 }
 0x177   : > { %v518_v28 = vpop.xlane.xlu1 %517 }
 0x178   : > { %v532_v29 = vmul.f32 %v524_v27, %v524_v27  ;;  %v528_v30 = vmul.f32 0.008, %v518_v28  ;;  %v544_v57 = vsub.f32 %v1271_v7, %v524_v27 }
 0x179   : > { %v504_v31 = vpop.xlane.xlu0 %503 }
 0x17a   : > { %v536_v32 = vsub.f32 %v528_v30, %v532_v29  ;;  %v523_v33 = vmul.f32 0.008, %v504_v31 }
 0x17b   : > { %v510_v34 = vpop.xlane.xlu1 %509 }
 0x17c   : > { %v540_v35 = vmax.f32 %v536_v32, 0.0  ;;  %v531_v38 = vmul.f32 %v523_v33, %v523_v33  ;;  %v526_v41 = vmul.f32 0.008, %v510_v34  ;;  %v543_v62 = vsub.f32 %v1276_v11, %v523_v33 }
 0x17d   : > { %v516_v36 = vpop.xlane.xlu0 %515 }
 0x17e   : > { %v548_v37 = vadd.f32 1e-05, %v540_v35  ;;  %v527_v39 = vmul.f32 0.008, %v516_v36  ;;  %v534_v49 = vmul.f32 %v526_v41, %v526_v41  ;;  %v546_v7 = vsub.f32 %v1278_v12, %v526_v41  ;;  %v1030_v12 = vld [vmem:[%s1411_s6] ss:$0 sm:$0xff] }
 0x17f   : > { %v508_v40 = vpop.xlane.xlu1 %507  ;;  %v1141_v35 = vld [vmem:[%s1414_s9] sm:$0xff]   ;;  %v1142_v36 = vld [vmem:[%s1414_s9 + $0x8] sm:$0xff]   ;;  %v1147_v41 = vld [vmem:[%s1414_s9 + $0x30] sm:$0xff]  }
 0x180   : > { %1149 = vrsqrt.f32 %v548_v37  ;;  %v535_v42 = vsub.f32 %v527_v39, %v531_v38  ;;  %v525_v43 = vmul.f32 0.008, %v508_v40  ;;  %1105 = vmatprep.subr.bf16.mxu0 %v1141_v35  ;;  %v1143_v37 = vld [vmem:[%s1414_s9 + $0x10] sm:$0xff]   ;;  %v1144_v38 = vld [vmem:[%s1414_s9 + $0x18] sm:$0xff]   ;;  %v1145_v39 = vld [vmem:[%s1414_s9 + $0x20] sm:$0xff]  }
 0x181   : > { %v520_v44 = vpop.xlane.xlu0 %519  ;;  %1106 = vmatpush3.bf16.msra.mxu0 %v1141_v35  ;;  %v1146_v40 = vld [vmem:[%s1414_s9 + $0x28] sm:$0xff]  }
 0x182   : > { %v539_v45 = vmax.f32 %v535_v42, 0.0  ;;  %v533_v46 = vmul.f32 %v525_v43, %v525_v43  ;;  %v529_v47 = vmul.f32 0.008, %v520_v44  ;;  %v545_v3 = vsub.f32 %v1281_v14, %v525_v43  ;;  %1107 = vmatprep.subr.bf16.mxu0 %v1142_v36  ;;  %v1148_v42 = vld [vmem:[%s1414_s9 + $0x38] sm:$0xff]  }
 0x183   : > { %v522_v48 = vpop.xlane.xlu1 %521 }
 0x184   : > { %v547_v50 = vadd.f32 1e-05, %v539_v45  ;;  %v537_v51 = vsub.f32 %v529_v47, %v533_v46  ;;  %v530_v52 = vmul.f32 0.008, %v522_v48 }
 0x185   : > { %1108 = vmatpush3.bf16.msra.mxu0 %v1142_v36 }
 0x186   : > { %1151 = vrsqrt.f32 %v547_v50  ;;  %v541_v53 = vmax.f32 %v537_v51, 0.0  ;;  %v538_v54 = vsub.f32 %v530_v52, %v534_v49  ;;  %1109 = vmatprep.subr.bf16.mxu0 %v1143_v37 }
 0x188   : > { %v549_v55 = vadd.f32 1e-05, %v541_v53  ;;  %v542_v56 = vmax.f32 %v538_v54, 0.0 }
 0x189   : > { %1110 = vmatpush3.bf16.msra.mxu0 %v1143_v37 }
 0x18a   : > { %v1150_v58 = vpop.eup %1149  ;;  %1153 = vrsqrt.f32 %v549_v55  ;;  %v550_v59 = vadd.f32 1e-05, %v542_v56  ;;  %1111 = vmatprep.subr.bf16.mxu0 %v1144_v38 }
 0x18b   : > { %v556_v60 = vmul.f32 %v1150_v58, %v544_v57 }
 0x18c   : > { %1155 = vrsqrt.f32 %v550_v59 }
 0x18d   : > { %v566_v63 = vmul.f32 %v1028_v61, %v556_v60  ;;  %1112 = vmatpush3.bf16.msra.mxu0 %v1144_v38 }
 0x18e   : > { %1113 = vmatprep.subr.bf16.mxu0 %v1145_v39 }
 0x18f   : > { %v576_v5 = vadd.f32 %v1029_v1, %v566_v63 }
 0x190   : > { %v1152_v0 = vpop.eup %1151 }
 0x191   : > { %v555_v2 = vmul.f32 %v1152_v0, %v543_v62  ;;  %v580_v15 = vmax.f32 %v576_v5, 0.0  ;;  %1114 = vmatpush3.bf16.msra.mxu0 %v1145_v39 }
 0x192   : > { %1115 = vmatprep.subr.bf16.mxu0 %v1146_v40 }
 0x193   : > { %v565_v4 = vmul.f32 %v1028_v61, %v555_v2 }
 0x194   : > { %v1154_v6 = vpop.eup %1153 }
 0x195   : > { %v575_v8 = vadd.f32 %v1029_v1, %v565_v4  ;;  %v557_v9 = vmul.f32 %v1154_v6, %v545_v3  ;;  %1116 = vmatpush3.bf16.msra.mxu0 %v1146_v40 }
 0x196   : > { %v1156_v10 = vpop.eup %1155  ;;  %1117 = vmatprep.subr.bf16.mxu0 %v1147_v41 }
 0x197   : > { %v579_v13 = vmax.f32 %v575_v8, 0.0  ;;  %v558_v11 = vmul.f32 %v1156_v10, %v546_v7  ;;  %v567_v16 = vmul.f32 %v1028_v61, %v557_v9 }
 0x199   : > { %v583_v17 = vpack.c.bf16 %v580_v15, %v579_v13  ;;  %v568_v18 = vmul.f32 %v1028_v61, %v558_v11  ;;  %v577_v19 = vadd.f32 %v1029_v1, %v567_v16  ;;  %1118 = vmatpush3.bf16.msra.mxu0 %v1147_v41  ;;  %v1039_v11 = vld [vmem:[%s1412_s7] ss:$0 sm:$0xff] }
 0x19a   : > { %1119 = vmatprep.subr.bf16.mxu0 %v1148_v42 }
 0x19b   : > { %1101 = vmatprep.mubr.bf16.mxu1 %v583_v17  ;;  %v578_v20 = vadd.f32 %v1029_v1, %v568_v18  ;;  %v581_v21 = vmax.f32 %v577_v19, 0.0  ;;  %v1040_v19 = vld [vmem:[%s1413_s8] ss:$0 sm:$0xff] }
 0x19d   : > { %v582_v22 = vmax.f32 %v578_v20, 0.0  ;;  %1120 = vmatpush3.bf16.msra.mxu0 %v1148_v42 }
 0x19f   : > { %v584_v14 = vpack.c.bf16 %v582_v22, %v581_v21 }
 0x1a1   : > { %1102 = vmatmul.mubr.bf16.vlgmr.msra.gmra.mrb[0].mxu1 %v584_v14 }
 0x274   : > { %v1103_v23 = vpop.f32.mrb[0].mxu1 }
 0x275   : > { %v1328_v24 = vadd.f32 %v1103_v23, %v1030_v12  ;;  %v690_v25 = vpop.f32.mrb[1].mxu1 }
 0x276   : > { %v1104_v26 = vpop.f32.mrb[2].mxu1  ;;  %v1333_v29 = vadd.f32 %v1030_v12, %v690_v25 }
 0x277   : > { %v1330_v27 = vadd.f32 %v1104_v26, %v1030_v12  ;;  %711 = vadd.xlane.f32.xlu0 %v1328_v24  ;;  %v693_v28 = vpop.f32.mrb[3].mxu1  ;;  %v717_v33 = vmul.f32 %v1328_v24, %v1328_v24 }
 0x278   : > { %v1336_v30 = vadd.f32 %v1030_v12, %v693_v28  ;;  %v715_v31 = vmul.f32 %v1333_v29, %v1333_v29 }
 0x279   : > { %713 = vadd.xlane.f32.xlu1 %v1330_v27  ;;  %v718_v34 = vmul.f32 %v1330_v27, %v1330_v27 }
 0x27a   : > { %v716_v32 = vmul.f32 %v1336_v30, %v1336_v30 }
 0x27b   : > { %707 = vadd.xlane.f32.xlu0 %v1333_v29 }
 0x27d   : > { %709 = vadd.xlane.f32.xlu1 %v1336_v30 }
 0x27f   : > { %719 = vadd.xlane.f32.xlu0 %v715_v31 }
 0x281   : > { %721 = vadd.xlane.f32.xlu1 %v716_v32 }
 0x283   : > { %723 = vadd.xlane.f32.xlu0 %v717_v33 }
 0x285   : > { %725 = vadd.xlane.f32.xlu1 %v718_v34 }
 0x304   : > { %v712_v43 = vpop.xlane.xlu0 %711 }
 0x305   : > { %v729_v50 = vmul.f32 0.008, %v712_v43 }
 0x306   : > { %v714_v44 = vpop.xlane.xlu1 %713 }
 0x307   : > { %v730_v53 = vmul.f32 0.008, %v714_v44  ;;  %v737_v59 = vmul.f32 %v729_v50, %v729_v50  ;;  %v749_v20 = vsub.f32 %v1328_v24, %v729_v50 }
 0x308   : > { %v708_v45 = vpop.xlane.xlu0 %707 }
 0x309   : > { %v727_v46 = vmul.f32 0.008, %v708_v45  ;;  %v738_v63 = vmul.f32 %v730_v53, %v730_v53  ;;  %v750_v12 = vsub.f32 %v1330_v27, %v730_v53  ;;  %v1041_v27 = vld [vmem:[%s1415_s10] ss:$0 sm:$0xff] }
 0x30a   : > { %v710_v47 = vpop.xlane.xlu1 %709 }
 0x30b   : > { %v728_v48 = vmul.f32 0.008, %v710_v47  ;;  %v735_v51 = vmul.f32 %v727_v46, %v727_v46  ;;  %v747_v13 = vsub.f32 %v1333_v29, %v727_v46 }
 0x30c   : > { %v720_v49 = vpop.xlane.xlu0 %719 }
 0x30d   : > { %v731_v52 = vmul.f32 0.008, %v720_v49  ;;  %v736_v55 = vmul.f32 %v728_v48, %v728_v48  ;;  %v748_v16 = vsub.f32 %v1336_v30, %v728_v48 }
 0x30e   : > { %v722_v54 = vpop.xlane.xlu1 %721 }
 0x30f   : > { %v739_v56 = vsub.f32 %v731_v52, %v735_v51  ;;  %v732_v57 = vmul.f32 0.008, %v722_v54 }
 0x310   : > { %v724_v58 = vpop.xlane.xlu0 %723 }
 0x311   : > { %v743_v60 = vmax.f32 %v739_v56, 0.0  ;;  %v740_v61 = vsub.f32 %v732_v57, %v736_v55  ;;  %v733_v62 = vmul.f32 0.008, %v724_v58 }
 0x312   : > { %v726_v0 = vpop.xlane.xlu1 %725 }
 0x313   : > { %v751_v1 = vadd.f32 1e-05, %v743_v60  ;;  %v744_v2 = vmax.f32 %v740_v61, 0.0  ;;  %v741_v3 = vsub.f32 %v733_v62, %v737_v59  ;;  %v734_v4 = vmul.f32 0.008, %v726_v0 }
 0x315   : > { %1157 = vrsqrt.f32 %v751_v1  ;;  %v752_v5 = vadd.f32 1e-05, %v744_v2  ;;  %v745_v6 = vmax.f32 %v741_v3, 0.0  ;;  %v742_v7 = vsub.f32 %v734_v4, %v738_v63 }
 0x317   : > { %1159 = vrsqrt.f32 %v752_v5  ;;  %v753_v8 = vadd.f32 1e-05, %v745_v6  ;;  %v746_v9 = vmax.f32 %v742_v7, 0.0 }
 0x319   : > { %1161 = vrsqrt.f32 %v753_v8  ;;  %v754_v10 = vadd.f32 1e-05, %v746_v9 }
 0x31b   : > { %1163 = vrsqrt.f32 %v754_v10 }
 0x31f   : > { %v1158_v15 = vpop.eup %1157 }
 0x320   : > { %v759_v17 = vmul.f32 %v1158_v15, %v747_v13 }
 0x321   : > { %v1160_v18 = vpop.eup %1159 }
 0x322   : > { %v760_v21 = vmul.f32 %v1160_v18, %v748_v16  ;;  %v769_v22 = vmul.f32 %v1039_v11, %v759_v17 }
 0x323   : > { %v1162_v14 = vpop.eup %1161 }
 0x324   : > { %v761_v23 = vmul.f32 %v1162_v14, %v749_v20  ;;  %v770_v25 = vmul.f32 %v1039_v11, %v760_v21  ;;  %v779_v26 = vadd.f32 %v1040_v19, %v769_v22 }
 0x325   : > { %v1164_v28 = vpop.eup %1163 }
 0x326   : > { %v762_v29 = vmul.f32 %v1164_v28, %v750_v12  ;;  %v780_v31 = vadd.f32 %v1040_v19, %v770_v25  ;;  %v771_v30 = vmul.f32 %v1039_v11, %v761_v23  ;;  %v783_v32 = vmax.f32 %v779_v26, 0.0 }
 0x328   : > { %v784_v33 = vmax.f32 %v780_v31, 0.0  ;;  %v772_v34 = vmul.f32 %v1039_v11, %v762_v29  ;;  %v781_v35 = vadd.f32 %v1040_v19, %v771_v30 }
 0x32a   : > { %v787_v36 = vpack.c.bf16 %v784_v33, %v783_v32  ;;  %v782_v37 = vadd.f32 %v1040_v19, %v772_v34  ;;  %v785_v24 = vmax.f32 %v781_v35, 0.0 }
 0x32c   : > { %1121 = vmatprep.mubr.bf16.mxu0 %v787_v36  ;;  %v786_v38 = vmax.f32 %v782_v37, 0.0 }
 0x32e   : > { %v788_v39 = vpack.c.bf16 %v786_v38, %v785_v24 }
 0x330   : > { %1122 = vmatmul.mubr.bf16.vlgmr.msra.gmra.mrb[4].mxu0 %v788_v39 }
 0x403   : > { %v1123_v40 = vpop.f32.mrb[4].mxu0 }
 0x404   : > { %v894_v41 = vpop.f32.mrb[5].mxu0  ;;  %v903_v45 = vadd.f32 %v1123_v40, %v1041_v27 }
 0x405   : > { %v895_v42 = vadd.f32 %v1041_v27, %v894_v41  ;;  %v1124_v43 = vpop.f32.mrb[6].mxu0 }
 0x406   : > { %v897_v44 = vpop.f32.mrb[7].mxu0  ;;  %v906_v48 = vadd.f32 %v1124_v43, %v1041_v27  ;;  %v916_v50 = vsel %vm909_vm1, %v903_v45, -inf }
 0x407   : > { %v898_v46 = vadd.f32 %v1041_v27, %v897_v44  ;;  %v910_v47 = vsel %vm909_vm1, %v895_v42, -inf }
 0x408   : > { %911 = vmax.xlane.f32.xlu0 %v910_v47  ;;  %v919_v51 = vsel %vm909_vm1, %v906_v48, -inf }
 0x409   : > { %v913_v49 = vsel %vm909_vm1, %v898_v46, -inf }
 0x40a   : > { %914 = vmax.xlane.f32.xlu1 %v913_v49 }
 0x40c   : > { %917 = vmax.xlane.f32.xlu0 %v916_v50 }
 0x40e   : > { %920 = vmax.xlane.f32.xlu1 %v919_v51 }
 0x495   : > { %v912_v52 = vpop.xlane.xlu0 %911 }
 0x496   : > { %v922_v53 = vsub.f32 %v895_v42, %v912_v52 }
 0x497   : > { %v915_v54 = vpop.xlane.xlu1 %914 }
 0x498   : > { %v926_v55 = vmul.f32 1.442695, %v922_v53  ;;  %v923_v56 = vsub.f32 %v898_v46, %v915_v54 }
 0x499   : > { %v918_v57 = vpop.xlane.xlu0 %917 }
 0x49a   : > { %1165 = vpow2.f32 %v926_v55  ;;  %v928_v58 = vmul.f32 1.442695, %v923_v56  ;;  %v924_v59 = vsub.f32 %v903_v45, %v918_v57 }
 0x49b   : > { %v921_v60 = vpop.xlane.xlu1 %920 }
 0x49c   : > { %1167 = vpow2.f32 %v928_v58  ;;  %v930_v61 = vmul.f32 1.442695, %v924_v59  ;;  %v925_v62 = vsub.f32 %v906_v48, %v921_v60 }
 0x49e   : > { %1169 = vpow2.f32 %v930_v61  ;;  %v932_v63 = vmul.f32 1.442695, %v925_v62 }
 0x4a0   : > { %1171 = vpow2.f32 %v932_v63 }
 0x4a4   : > { %v1166_v0 = vpop.eup %1165 }
 0x4a5   : > { %v934_v1 = vsel %vm909_vm1, %v1166_v0, 0.0 }
 0x4a6   : > { %v1168_v2 = vpop.eup %1167  ;;  %935 = vadd.xlane.f32.xlu0 %v934_v1 }
 0x4a7   : > { %v937_v3 = vsel %vm909_vm1, %v1168_v2, 0.0 }
 0x4a8   : > { %v1170_v4 = vpop.eup %1169  ;;  %938 = vadd.xlane.f32.xlu1 %v937_v3 }
 0x4a9   : > { %v940_v5 = vsel %vm909_vm1, %v1170_v4, 0.0 }
 0x4aa   : > { %v1172_v6 = vpop.eup %1171  ;;  %941 = vadd.xlane.f32.xlu0 %v940_v5 }
 0x4ab   : > { %v943_v7 = vsel %vm909_vm1, %v1172_v6, 0.0 }
 0x4ac   : > { %944 = vadd.xlane.f32.xlu1 %v943_v7 }
 0x533   : > { %v936_v8 = vpop.xlane.xlu0 %935 }
 0x534   : > { %1173 = vrcp.f32 %v936_v8 }
 0x535   : > { %v939_v9 = vpop.xlane.xlu1 %938 }
 0x536   : > { %1175 = vrcp.f32 %v939_v9 }
 0x537   : > { %v942_v10 = vpop.xlane.xlu0 %941 }
 0x538   : > { %1177 = vrcp.f32 %v942_v10 }
 0x539   : > { %v945_v13 = vpop.xlane.xlu1 %944 }
 0x53a   : > { %1179 = vrcp.f32 %v945_v13 }
 0x53e   : > { %v1174_v15 = vpop.eup %1173 }
 0x53f   : > { %v950_v11 = vmul.f32 %v1174_v15, %v1166_v0 }
 0x540   : > { %v1176_v16 = vpop.eup %1175 }
 0x541   : > { %954 = vst.msk [vmem:[%s388_s26] sm:$0xff] %vm909_vm1, %v950_v11  ;;  %v951_v17 = vmul.f32 %v1176_v16, %v1168_v2 }
 0x542   : > { %v1178_v18 = vpop.eup %1177 }
 0x543   : > { %955 = vst.msk [vmem:[%s388_s26 + $0x8] sm:$0xff] %vm909_vm1, %v951_v17  ;;  %v952_v19 = vmul.f32 %v1178_v18, %v1170_v4 }
 0x544   : > { %v1180_v20 = vpop.eup %1179 }
 0x545   : > { %956 = vst.msk [vmem:[%s388_s26 + $0x10] sm:$0xff] %vm909_vm1, %v952_v19  ;;  %v953_v21 = vmul.f32 %v1180_v20, %v1172_v6 }
 0x547   : > { %957 = vst.msk [vmem:[%s388_s26 + $0x18] sm:$0xff] %vm909_vm1, %v953_v21 }
 0x548 PF: > { %s21_s17 = sadd.s32 1, %s1187_s17  }
 0x549   : > { %p18_p4 = scmp.ge.s32.totalorder %s21_s17, 4  }
 0x54b   :  { %20 = sbr.rel (!%p18_p4) target bundleno = 1 (0x1), region = 94 }

</bundles_post_ra>
